<compile_context>
chip_gen: v7x
topology: tpu7x:2x2x1
jax: 0.10.0
libtpu: 0.0.40
codegen_flags: <defaults>
</compile_context>

<pallas_src>
import functools

import jax
import jax.numpy as jnp
from jax import lax
from jax.experimental import pallas as pl
from jax.experimental.pallas import tpu as pltpu


def _round_up(a: int, m: int) -> int:
    return ((a + m - 1) // m) * m


def _tpu_info():
    """Returns (mxu_m_tile, num_tensorcores, usable_vmem_bytes)."""
    mxu_m, num_tc, vmem_cap = 256, 1, 100 << 20          # v6e-like defaults
    kind = ""
    try:
        kind = jax.devices()[0].device_kind.lower()
    except Exception:
        pass
    if ("v5 lite" in kind) or ("v5e" in kind) or ("v5litepod" in kind):
        mxu_m = 128                                      # 128x128 MXU, 1 TC, 128 MiB VMEM
    elif "v7" in kind:
        num_tc, vmem_cap = 2, 52 << 20                   # 64 MiB/TC physical, keep headroom
    # Prefer the structured hardware query over device-kind string sniffing.
    try:
        info = pltpu.get_tpu_info()
        phys = int(getattr(info, "vmem_capacity_bytes", 0) or 0)
        if phys > 0:
            vmem_cap = min(vmem_cap, (phys * 13) // 16)  # ~81% of physical: compiler scratch headroom
    except Exception:
        pass
    return mxu_m, num_tc, vmem_cap


def _invariant_spec(block_shape, index_map):
    """Grid-invariant operand: single-buffered so it is resident ONCE in VMEM.

    Falls back to the default (double-buffered) spec if this JAX version does
    not accept pipeline_mode / Buffered(1).
    """
    try:
        return pl.BlockSpec(block_shape, index_map, pipeline_mode=pl.Buffered(1))
    except Exception:
        return pl.BlockSpec(block_shape, index_map)


def _nnmf_linear_kernel(x_ref, w_ref, wt_ref, h0_ref, o_ref, *,
                        epsilon_0, n_iter, approx_recip, mxu_dtype, unroll):
    def recip(v):
        if approx_recip:
            return pl.reciprocal(v, approx=True)          # EUP slot, ~free
        return 1.0 / v

    # One-time exact input row-normalization (matches module.forward()).
    # Zero-padded batch rows stay all-zero: ratio=0, upd=0, and the final
    # per-row scale is finite (recip(1e-20) ~ 1e20 in f32), so 0 * scale = 0.
    x = x_ref[...].astype(jnp.float32)                    # [TB, N_in]
    x = x * recip(jnp.sum(x, axis=-1, keepdims=True) + 1e-20)

    w = w_ref[...]                                        # [N_out_pad, N_in]  (mxu dtype)
    wt = wt_ref[...]                                      # [N_in, N_out_pad]

    tb = x_ref.shape[0]
    n_out = w_ref.shape[0]

    # h = tile(h_initial, [TB, 1]) -- broadcast hoisted out of the loop.
    h0 = h0_ref[...].astype(jnp.float32)                  # [1, N_out_pad]
    h = jnp.broadcast_to(h0, (tb, n_out))                 # [TB, N_out_pad]

    def body(_, h):
        # denom[b, i] = sum_j h[b, j] * W[j, i]
        denom = jnp.dot(h.astype(mxu_dtype), w,
                        preferred_element_type=jnp.float32)   # [TB, N_in]
        # Fused cast: the f32 ratio never persists across the second matmul.
        ratio = (x * recip(denom + 1e-20)).astype(mxu_dtype)  # [TB, N_in]
        # upd[b, j] = sum_i ratio[b, i] * W[j, i]  (W.T pre-materialized)
        upd = jnp.dot(ratio, wt,
                      preferred_element_type=jnp.float32)     # [TB, N_out_pad]
        h_w = h * upd
        if epsilon_0 > 0.0:
            h_new = h + epsilon_0 * h_w
        else:
            h_new = h_w
        return h_new * recip(jnp.sum(h_new, axis=-1, keepdims=True) + 1e-20)

    # fori_loop keeps the live ranges bounded; unroll=True only when the
    # per-iteration working set fits in the vreg file (LLO visibility).
    h = lax.fori_loop(0, n_iter, body, h, unroll=unroll)

    o_ref[...] = h.astype(o_ref.dtype)


def nnmf_linear_forward(x, weights, h_initial, *, epsilon_0, n_iter,
                        batch_tile=None, use_bf16_matmul=True,
                        approx_reciprocal=True):
    B, n_in = x.shape
    n_out, n_in_w = weights.shape
    assert n_in_w == n_in

    mxu_m, num_tc, vmem_cap = _tpu_info()

    # ---- lane-dense N_out: pad to a multiple of 128 --------------------------
    # Zero-padded W rows / h_initial entries are exactly inert through every
    # iteration (their upd is 0), so the real columns are unchanged.
    n_out_pad = _round_up(n_out, 128)
    # TODO(synk): also pad a ragged N_in to a multiple of 128 for lane-dense loads.

    mxu_dtype = jnp.bfloat16 if use_bf16_matmul else jnp.float32
    w_itemsize = 2 if use_bf16_matmul else 4
    x_itemsize = jnp.dtype(x.dtype).itemsize

    # ---- VMEM accounting (includes in-kernel f32 temporaries) ----------------
    resident = (2 * n_out_pad * n_in * w_itemsize        # W + W.T, single-buffered
                + n_out_pad * 4)                         # h_initial
    per_row = (2 * n_in * x_itemsize                     # x tile (pipelined, double-buffered)
               + 2 * n_out_pad * x_itemsize              # out tile (double-buffered)
               + 4 * n_in * 4                            # f32 x, denom, ratio (+ cast copy)
               + 4 * n_out_pad * 4)                      # f32 h, upd, h_w, h_new
    max_rows = (vmem_cap - resident) // per_row
    # TODO(synk): if resident alone exceeds vmem_cap, K-tile N_in (emit_pipeline).

    # ---- batch-tile selection -------------------------------------------------
    if batch_tile is None:
        if num_tc >= 2 and B >= 2 * mxu_m:
            # 2-TC chip (v7x): one MXU-native multiple per TensorCore.
            batch_tile = _round_up(pl.cdiv(B, 2), mxu_m)
        else:
            # Single-TC chip: one grid step per call unless VMEM-bound.
            batch_tile = _round_up(B, 8)
        max_rows_c = max(8, max_rows)
        if batch_tile > max_rows_c:
            if max_rows_c >= mxu_m:
                batch_tile = (max_rows_c // mxu_m) * mxu_m
            else:
                batch_tile = (max_rows_c // 8) * 8
        batch_tile = max(8, batch_tile)
    batch_tile = max(8, _round_up(int(batch_tile), 8))

    padded_B = _round_up(B, batch_tile)
    if padded_B != B:
        x = jnp.pad(x, ((0, padded_B - B), (0, 0)))      # zero rows are inert
    grid = padded_B // batch_tile

    # ---- operand preparation (one-time, outside the hot loop) ----------------
    w = weights.astype(mxu_dtype)                         # [N_out, N_in]
    h0 = h_initial.reshape(1, n_out).astype(jnp.float32)  # [1, N_out]
    if n_out_pad != n_out:
        w = jnp.pad(w, ((0, n_out_pad - n_out), (0, 0)))
        h0 = jnp.pad(h0, ((0, 0), (0, n_out_pad - n_out)))
    wt = w.T                                              # [N_in, N_out_pad]

    # Unroll only when the per-iteration live set fits the vreg file.
    live_bytes = batch_tile * (2 * n_in + 2 * n_out_pad) * 4
    unroll_iters = bool(live_bytes <= (256 << 10))

    kernel = functools.partial(
        _nnmf_linear_kernel,
        epsilon_0=float(epsilon_0),
        n_iter=int(n_iter),
        approx_recip=bool(approx_reciprocal),
        mxu_dtype=mxu_dtype,
        unroll=unroll_iters,
    )

    # ---- compiler params / cost estimate --------------------------------------
    est_vmem = resident + batch_tile * per_row
    cp_kwargs = dict(dimension_semantics=("parallel",))
    if est_vmem > (16 << 20):
        cp_kwargs["vmem_limit_bytes"] = int(min(vmem_cap,
                                                max(32 << 20, est_vmem * 5 // 4)))
    compiler_params = pltpu.CompilerParams(**cp_kwargs)

    cost = pl.CostEstimate(
        flops=int(4 * n_iter * padded_B * n_in * n_out_pad),
        transcendentals=int(n_iter * padded_B * (n_in + 1) + padded_B)
        if approx_reciprocal else 0,
        bytes_accessed=int(padded_B * n_in * x_itemsize
                           + 2 * n_out_pad * n_in * w_itemsize
                           + n_out_pad * 4
                           + padded_B * n_out_pad * x_itemsize),
    )

    out = pl.pallas_call(
        kernel,
        out_shape=jax.ShapeDtypeStruct((padded_B, n_out_pad), x.dtype),
        grid=(grid,),
        in_specs=[
            pl.BlockSpec((batch_tile, n_in), lambda i: (i, 0)),     # x tile (pipelined)
            _invariant_spec((n_out_pad, n_in), lambda i: (0, 0)),   # W    (resident, 1x)
            _invariant_spec((n_in, n_out_pad), lambda i: (0, 0)),   # W.T  (resident, 1x)
            _invariant_spec((1, n_out_pad), lambda i: (0, 0)),      # h_initial
        ],
        out_specs=pl.BlockSpec((batch_tile, n_out_pad), lambda i: (i, 0)),
        compiler_params=compiler_params,
        cost_estimate=cost,
    )(x, w, wt, h0)

    if padded_B != B or n_out_pad != n_out:
        out = out[:B, :n_out]
    return out


def nnmf_linear_reference(x, weights, h_initial, epsilon_0, n_iter):
    """Literal JAX translation of the PyTorch forward (materializes 3-D tensor)."""
    x = x / (x.sum(axis=1, keepdims=True) + 1e-20)
    h = jnp.tile(h_initial[None, :], (x.shape[0], 1))
    for _ in range(n_iter):
        h_w = h[:, :, None] * weights[None, :, :]
        h_w = h_w / (h_w.sum(axis=1, keepdims=True) + 1e-20)
        h_w = (h_w * x[:, None, :]).sum(axis=-1)
        if epsilon_0 > 0.0:
            h = h + epsilon_0 * h_w
        else:
            h = h_w
        h = h / (h.sum(axis=1, keepdims=True) + 1e-20)
    return h


if __name__ == "__main__":
    # Module hyper-parameters (NNMFLinear.__init__)
    number_of_input_neurons = 128
    number_of_neurons = 32          # > 2 as required
    number_of_iterations = 5
    epsilon_0 = 1.0
    weight_noise_range = (0.0, 1.0)

    B = 16
    dtype = jnp.float32

    key = jax.random.PRNGKey(0)
    kw, kx = jax.random.split(key)

    # weights: uniform(a, b) then row-normalized (weights.setter divides by row sum)
    w_raw = jax.random.uniform(kw, (number_of_neurons, number_of_input_neurons),
                               dtype=dtype,
                               minval=weight_noise_range[0],
                               maxval=weight_noise_range[1])
    weights = w_raw / jnp.sum(w_raw, axis=1, keepdims=True)

    # h_initial: uniform 1/N_out (set_h_init_to_uniform)
    h_initial = jnp.full((number_of_neurons,), 1.0 / number_of_neurons, dtype=dtype)

    # non-negative input (NNMF assumes non-negative data)
    x = jax.random.uniform(kx, (B, number_of_input_neurons), dtype=dtype)

    ref = nnmf_linear_reference(x, weights, h_initial, epsilon_0,
                                number_of_iterations)

    # Exact configuration: f32 MXU operands, exact reciprocals -> tight check.
    out_exact = nnmf_linear_forward(x, weights, h_initial,
                                    epsilon_0=epsilon_0,
                                    n_iter=number_of_iterations,
                                    use_bf16_matmul=False,
                                    approx_reciprocal=False)
    out_exact = jax.block_until_ready(out_exact)
    assert out_exact.shape == (B, number_of_neurons)
    assert jnp.allclose(out_exact, ref, rtol=1e-3, atol=1e-4), (
        f"exact-path max abs err {jnp.max(jnp.abs(out_exact - ref))}")

    # Fast configuration (default): bf16 MXU operands + EUP approx reciprocal.
    # NOTE: bf16 + approx-recip error compounds with n_iter; re-validate the
    # tolerance at production iteration counts / shapes.
    out_fast = nnmf_linear_forward(x, weights, h_initial,
                                   epsilon_0=epsilon_0,
                                   n_iter=number_of_iterations)
    out_fast = jax.block_until_ready(out_fast)
    assert out_fast.shape == (B, number_of_neurons)
    assert jnp.allclose(out_fast, ref, rtol=3e-2, atol=2e-3), (
        f"fast-path max abs err {jnp.max(jnp.abs(out_fast - ref))}")

    print("KERNEL_OK")
</pallas_src>

<mosaic_0001>
module attributes {stable_mosaic.version = 11 : i64} {
  func.func @_nnmf_linear_kernel(%arg0: i32, %arg1: memref<16x128xf32, #tpu.memory_space<vmem>>, %arg2: memref<128x128xf32, #tpu.memory_space<vmem>>, %arg3: memref<128x128xf32, #tpu.memory_space<vmem>>, %arg4: memref<1x128xf32, #tpu.memory_space<vmem>>, %arg5: memref<16x128xf32, #tpu.memory_space<vmem>>) attributes {dimension_semantics = [#tpu.dimension_semantics<parallel>], iteration_bounds = array<i64: 1>, scalar_prefetch = 0 : i64, scratch_operands = 0 : i64, tpu.core_type = #tpu.core_type<tc>, window_params = [{transform_indices = @transform_0, window_bounds = array<i64: 16, 128>}, {pipeline_mode = #tpu.pipeline_mode<synchronous>, transform_indices = @transform_1, window_bounds = array<i64: 128, 128>}, {pipeline_mode = #tpu.pipeline_mode<synchronous>, transform_indices = @transform_2, window_bounds = array<i64: 128, 128>}, {pipeline_mode = #tpu.pipeline_mode<synchronous>, transform_indices = @transform_3, window_bounds = array<i64: 1, 128>}, {transform_indices = @transform_4, window_bounds = array<i64: 16, 128>}]} {
    %c0 = arith.constant 0 : index
    %c0_0 = arith.constant 0 : index
    %0 = vector.load %arg1[%c0, %c0_0] : memref<16x128xf32, #tpu.memory_space<vmem>>, vector<16x128xf32>
    %cst = arith.constant dense<0.000000e+00> : vector<16xf32>
    %1 = vector.multi_reduction <add>, %0, %cst [1] : vector<16x128xf32> to vector<16xf32>
    %2 = vector.shape_cast %1 : vector<16xf32> to vector<16x1xf32>
    %cst_1 = arith.constant 9.99999968E-21 : f32
    %3 = vector.broadcast %cst_1 : f32 to vector<16x1xf32>
    %4 = arith.addf %2, %3 : vector<16x1xf32>
    %cst_2 = arith.constant 1.000000e+00 : f32
    %5 = vector.broadcast %cst_2 : f32 to vector<16x1xf32>
    %6 = arith.divf %5, %4 : vector<16x1xf32>
    %7 = vector.broadcast %6 : vector<16x1xf32> to vector<16x128xf32>
    %8 = arith.mulf %0, %7 : vector<16x128xf32>
    %c0_3 = arith.constant 0 : index
    %c0_4 = arith.constant 0 : index
    %9 = vector.load %arg2[%c0_3, %c0_4] : memref<128x128xf32, #tpu.memory_space<vmem>>, vector<128x128xf32>
    %c0_5 = arith.constant 0 : index
    %c0_6 = arith.constant 0 : index
    %10 = vector.load %arg3[%c0_5, %c0_6] : memref<128x128xf32, #tpu.memory_space<vmem>>, vector<128x128xf32>
    %c0_7 = arith.constant 0 : index
    %c0_8 = arith.constant 0 : index
    %11 = vector.load %arg4[%c0_7, %c0_8] : memref<1x128xf32, #tpu.memory_space<vmem>>, vector<1x128xf32>
    %12 = vector.shape_cast %11 : vector<1x128xf32> to vector<1x128xf32>
    %13 = vector.broadcast %12 : vector<1x128xf32> to vector<16x128xf32>
    %c0_i32 = arith.constant 0 : i32
    %cst_9 = arith.constant dense<0.000000e+00> : vector<16x128xf32>
    %14 = tpu.matmul %13, %9, %cst_9 {dimension_numbers = #tpu.dot_dimension_numbers<[1], [0], [0], [1], [0, 0, 1, 1], [], []>} : vector<16x128xf32>, vector<128x128xf32>, vector<16x128xf32> -> vector<16x128xf32>
    %cst_10 = arith.constant 9.99999968E-21 : f32
    %15 = vector.broadcast %cst_10 : f32 to vector<16x128xf32>
    %16 = arith.addf %14, %15 : vector<16x128xf32>
    %cst_11 = arith.constant 1.000000e+00 : f32
    %17 = vector.broadcast %cst_11 : f32 to vector<16x128xf32>
    %18 = arith.divf %17, %16 : vector<16x128xf32>
    %19 = arith.mulf %8, %18 : vector<16x128xf32>
    %cst_12 = arith.constant dense<0.000000e+00> : vector<16x128xf32>
    %20 = tpu.matmul %19, %10, %cst_12 {dimension_numbers = #tpu.dot_dimension_numbers<[1], [0], [0], [1], [0, 0, 1, 1], [], []>} : vector<16x128xf32>, vector<128x128xf32>, vector<16x128xf32> -> vector<16x128xf32>
    %21 = arith.mulf %13, %20 : vector<16x128xf32>
    %cst_13 = arith.constant 1.000000e+00 : f32
    %22 = vector.broadcast %cst_13 : f32 to vector<16x128xf32>
    %23 = arith.mulf %22, %21 : vector<16x128xf32>
    %24 = arith.addf %13, %23 : vector<16x128xf32>
    %cst_14 = arith.constant dense<0.000000e+00> : vector<16xf32>
    %25 = vector.multi_reduction <add>, %24, %cst_14 [1] : vector<16x128xf32> to vector<16xf32>
    %26 = vector.shape_cast %25 : vector<16xf32> to vector<16x1xf32>
    %cst_15 = arith.constant 9.99999968E-21 : f32
    %27 = vector.broadcast %cst_15 : f32 to vector<16x1xf32>
    %28 = arith.addf %26, %27 : vector<16x1xf32>
    %cst_16 = arith.constant 1.000000e+00 : f32
    %29 = vector.broadcast %cst_16 : f32 to vector<16x1xf32>
    %30 = arith.divf %29, %28 : vector<16x1xf32>
    %31 = vector.broadcast %30 : vector<16x1xf32> to vector<16x128xf32>
    %32 = arith.mulf %24, %31 : vector<16x128xf32>
    %c1_i32 = arith.constant 1 : i32
    %cst_17 = arith.constant dense<0.000000e+00> : vector<16x128xf32>
    %33 = tpu.matmul %32, %9, %cst_17 {dimension_numbers = #tpu.dot_dimension_numbers<[1], [0], [0], [1], [0, 0, 1, 1], [], []>} : vector<16x128xf32>, vector<128x128xf32>, vector<16x128xf32> -> vector<16x128xf32>
    %cst_18 = arith.constant 9.99999968E-21 : f32
    %34 = vector.broadcast %cst_18 : f32 to vector<16x128xf32>
    %35 = arith.addf %33, %34 : vector<16x128xf32>
    %cst_19 = arith.constant 1.000000e+00 : f32
    %36 = vector.broadcast %cst_19 : f32 to vector<16x128xf32>
    %37 = arith.divf %36, %35 : vector<16x128xf32>
    %38 = arith.mulf %8, %37 : vector<16x128xf32>
    %cst_20 = arith.constant dense<0.000000e+00> : vector<16x128xf32>
    %39 = tpu.matmul %38, %10, %cst_20 {dimension_numbers = #tpu.dot_dimension_numbers<[1], [0], [0], [1], [0, 0, 1, 1], [], []>} : vector<16x128xf32>, vector<128x128xf32>, vector<16x128xf32> -> vector<16x128xf32>
    %40 = arith.mulf %32, %39 : vector<16x128xf32>
    %cst_21 = arith.constant 1.000000e+00 : f32
    %41 = vector.broadcast %cst_21 : f32 to vector<16x128xf32>
    %42 = arith.mulf %41, %40 : vector<16x128xf32>
    %43 = arith.addf %32, %42 : vector<16x128xf32>
    %cst_22 = arith.constant dense<0.000000e+00> : vector<16xf32>
    %44 = vector.multi_reduction <add>, %43, %cst_22 [1] : vector<16x128xf32> to vector<16xf32>
    %45 = vector.shape_cast %44 : vector<16xf32> to vector<16x1xf32>
    %cst_23 = arith.constant 9.99999968E-21 : f32
    %46 = vector.broadcast %cst_23 : f32 to vector<16x1xf32>
    %47 = arith.addf %45, %46 : vector<16x1xf32>
    %cst_24 = arith.constant 1.000000e+00 : f32
    %48 = vector.broadcast %cst_24 : f32 to vector<16x1xf32>
    %49 = arith.divf %48, %47 : vector<16x1xf32>
    %50 = vector.broadcast %49 : vector<16x1xf32> to vector<16x128xf32>
    %51 = arith.mulf %43, %50 : vector<16x128xf32>
    %c2_i32 = arith.constant 2 : i32
    %cst_25 = arith.constant dense<0.000000e+00> : vector<16x128xf32>
    %52 = tpu.matmul %51, %9, %cst_25 {dimension_numbers = #tpu.dot_dimension_numbers<[1], [0], [0], [1], [0, 0, 1, 1], [], []>} : vector<16x128xf32>, vector<128x128xf32>, vector<16x128xf32> -> vector<16x128xf32>
    %cst_26 = arith.constant 9.99999968E-21 : f32
    %53 = vector.broadcast %cst_26 : f32 to vector<16x128xf32>
    %54 = arith.addf %52, %53 : vector<16x128xf32>
    %cst_27 = arith.constant 1.000000e+00 : f32
    %55 = vector.broadcast %cst_27 : f32 to vector<16x128xf32>
    %56 = arith.divf %55, %54 : vector<16x128xf32>
    %57 = arith.mulf %8, %56 : vector<16x128xf32>
    %cst_28 = arith.constant dense<0.000000e+00> : vector<16x128xf32>
    %58 = tpu.matmul %57, %10, %cst_28 {dimension_numbers = #tpu.dot_dimension_numbers<[1], [0], [0], [1], [0, 0, 1, 1], [], []>} : vector<16x128xf32>, vector<128x128xf32>, vector<16x128xf32> -> vector<16x128xf32>
    %59 = arith.mulf %51, %58 : vector<16x128xf32>
    %cst_29 = arith.constant 1.000000e+00 : f32
    %60 = vector.broadcast %cst_29 : f32 to vector<16x128xf32>
    %61 = arith.mulf %60, %59 : vector<16x128xf32>
    %62 = arith.addf %51, %61 : vector<16x128xf32>
    %cst_30 = arith.constant dense<0.000000e+00> : vector<16xf32>
    %63 = vector.multi_reduction <add>, %62, %cst_30 [1] : vector<16x128xf32> to vector<16xf32>
    %64 = vector.shape_cast %63 : vector<16xf32> to vector<16x1xf32>
    %cst_31 = arith.constant 9.99999968E-21 : f32
    %65 = vector.broadcast %cst_31 : f32 to vector<16x1xf32>
    %66 = arith.addf %64, %65 : vector<16x1xf32>
    %cst_32 = arith.constant 1.000000e+00 : f32
    %67 = vector.broadcast %cst_32 : f32 to vector<16x1xf32>
    %68 = arith.divf %67, %66 : vector<16x1xf32>
    %69 = vector.broadcast %68 : vector<16x1xf32> to vector<16x128xf32>
    %70 = arith.mulf %62, %69 : vector<16x128xf32>
    %c3_i32 = arith.constant 3 : i32
    %cst_33 = arith.constant dense<0.000000e+00> : vector<16x128xf32>
    %71 = tpu.matmul %70, %9, %cst_33 {dimension_numbers = #tpu.dot_dimension_numbers<[1], [0], [0], [1], [0, 0, 1, 1], [], []>} : vector<16x128xf32>, vector<128x128xf32>, vector<16x128xf32> -> vector<16x128xf32>
    %cst_34 = arith.constant 9.99999968E-21 : f32
    %72 = vector.broadcast %cst_34 : f32 to vector<16x128xf32>
    %73 = arith.addf %71, %72 : vector<16x128xf32>
    %cst_35 = arith.constant 1.000000e+00 : f32
    %74 = vector.broadcast %cst_35 : f32 to vector<16x128xf32>
    %75 = arith.divf %74, %73 : vector<16x128xf32>
    %76 = arith.mulf %8, %75 : vector<16x128xf32>
    %cst_36 = arith.constant dense<0.000000e+00> : vector<16x128xf32>
    %77 = tpu.matmul %76, %10, %cst_36 {dimension_numbers = #tpu.dot_dimension_numbers<[1], [0], [0], [1], [0, 0, 1, 1], [], []>} : vector<16x128xf32>, vector<128x128xf32>, vector<16x128xf32> -> vector<16x128xf32>
    %78 = arith.mulf %70, %77 : vector<16x128xf32>
    %cst_37 = arith.constant 1.000000e+00 : f32
    %79 = vector.broadcast %cst_37 : f32 to vector<16x128xf32>
    %80 = arith.mulf %79, %78 : vector<16x128xf32>
    %81 = arith.addf %70, %80 : vector<16x128xf32>
    %cst_38 = arith.constant dense<0.000000e+00> : vector<16xf32>
    %82 = vector.multi_reduction <add>, %81, %cst_38 [1] : vector<16x128xf32> to vector<16xf32>
    %83 = vector.shape_cast %82 : vector<16xf32> to vector<16x1xf32>
    %cst_39 = arith.constant 9.99999968E-21 : f32
    %84 = vector.broadcast %cst_39 : f32 to vector<16x1xf32>
    %85 = arith.addf %83, %84 : vector<16x1xf32>
    %cst_40 = arith.constant 1.000000e+00 : f32
    %86 = vector.broadcast %cst_40 : f32 to vector<16x1xf32>
    %87 = arith.divf %86, %85 : vector<16x1xf32>
    %88 = vector.broadcast %87 : vector<16x1xf32> to vector<16x128xf32>
    %89 = arith.mulf %81, %88 : vector<16x128xf32>
    %c4_i32 = arith.constant 4 : i32
    %cst_41 = arith.constant dense<0.000000e+00> : vector<16x128xf32>
    %90 = tpu.matmul %89, %9, %cst_41 {dimension_numbers = #tpu.dot_dimension_numbers<[1], [0], [0], [1], [0, 0, 1, 1], [], []>} : vector<16x128xf32>, vector<128x128xf32>, vector<16x128xf32> -> vector<16x128xf32>
    %cst_42 = arith.constant 9.99999968E-21 : f32
    %91 = vector.broadcast %cst_42 : f32 to vector<16x128xf32>
    %92 = arith.addf %90, %91 : vector<16x128xf32>
    %cst_43 = arith.constant 1.000000e+00 : f32
    %93 = vector.broadcast %cst_43 : f32 to vector<16x128xf32>
    %94 = arith.divf %93, %92 : vector<16x128xf32>
    %95 = arith.mulf %8, %94 : vector<16x128xf32>
    %cst_44 = arith.constant dense<0.000000e+00> : vector<16x128xf32>
    %96 = tpu.matmul %95, %10, %cst_44 {dimension_numbers = #tpu.dot_dimension_numbers<[1], [0], [0], [1], [0, 0, 1, 1], [], []>} : vector<16x128xf32>, vector<128x128xf32>, vector<16x128xf32> -> vector<16x128xf32>
    %97 = arith.mulf %89, %96 : vector<16x128xf32>
    %cst_45 = arith.constant 1.000000e+00 : f32
    %98 = vector.broadcast %cst_45 : f32 to vector<16x128xf32>
    %99 = arith.mulf %98, %97 : vector<16x128xf32>
    %100 = arith.addf %89, %99 : vector<16x128xf32>
    %cst_46 = arith.constant dense<0.000000e+00> : vector<16xf32>
    %101 = vector.multi_reduction <add>, %100, %cst_46 [1] : vector<16x128xf32> to vector<16xf32>
    %102 = vector.shape_cast %101 : vector<16xf32> to vector<16x1xf32>
    %cst_47 = arith.constant 9.99999968E-21 : f32
    %103 = vector.broadcast %cst_47 : f32 to vector<16x1xf32>
    %104 = arith.addf %102, %103 : vector<16x1xf32>
    %cst_48 = arith.constant 1.000000e+00 : f32
    %105 = vector.broadcast %cst_48 : f32 to vector<16x1xf32>
    %106 = arith.divf %105, %104 : vector<16x1xf32>
    %107 = vector.broadcast %106 : vector<16x1xf32> to vector<16x128xf32>
    %108 = arith.mulf %100, %107 : vector<16x128xf32>
    %c0_49 = arith.constant 0 : index
    %c0_50 = arith.constant 0 : index
    %109 = vector.load %arg5[%c0_49, %c0_50] : memref<16x128xf32, #tpu.memory_space<vmem>>, vector<16x128xf32>
    tpu.vector_store %arg5[%c0_49, %c0_50], %108 {strides = array<i32>} : memref<16x128xf32, #tpu.memory_space<vmem>>, vector<16x128xf32>,
    return
  }
  func.func @transform_0(%arg0: i32) -> (i32, i32) {
    %c0_i32 = arith.constant 0 : i32
    %c0_i32_0 = arith.constant 0 : i32
    return %arg0, %c0_i32 : i32, i32
  }
  func.func @transform_1(%arg0: i32) -> (i32, i32) {
    %c0_i32 = arith.constant 0 : i32
    %c0_i32_0 = arith.constant 0 : i32
    %c0_i32_1 = arith.constant 0 : i32
    return %c0_i32, %c0_i32_0 : i32, i32
  }
  func.func @transform_2(%arg0: i32) -> (i32, i32) {
    %c0_i32 = arith.constant 0 : i32
    %c0_i32_0 = arith.constant 0 : i32
    %c0_i32_1 = arith.constant 0 : i32
    return %c0_i32, %c0_i32_0 : i32, i32
  }
  func.func @transform_3(%arg0: i32) -> (i32, i32) {
    %c0_i32 = arith.constant 0 : i32
    %c0_i32_0 = arith.constant 0 : i32
    %c0_i32_1 = arith.constant 0 : i32
    return %c0_i32, %c0_i32_0 : i32, i32
  }
  func.func @transform_4(%arg0: i32) -> (i32, i32) {
    %c0_i32 = arith.constant 0 : i32
    %c0_i32_0 = arith.constant 0 : i32
    return %arg0, %c0_i32 : i32, i32
  }
}

</mosaic_0001>

<bundles_post_ra>
// kernel: tpu_custom_call.1
= control target key start
LH: loop header
LB: loop body
LE: loop exit
PB: predicated region body
PF: predicated region fallthrough
CT: control target
= control target key end

     0   :  { %9 = vsyncpa [#allocation3], 0  ;;  %s2310_s0 = inlined_call_operand.hbm [shape: f32[16,128], index: 0, kind: input, shape index: {}]   ;;  %s2311_s1 = inlined_call_operand.hbm [shape: f32[128,128], index: 1, kind: input, shape index: {}]   ;;  %s2312_s2 = inlined_call_operand.hbm [shape: f32[128,128], index: 2, kind: input, shape index: {}]   ;;  %s2313_s3 = inlined_call_operand.vmem [shape: f32[1,128], index: 3, kind: input, shape index: {}]   ;;  %s2314_s4 = inlined_call_operand.hbm [shape: f32[16,128], index: 4, kind: output, shape index: {}]  }
   0x1   :  { %10 = vsyncpa [#allocation6], 0 }
   0x2   :  { %11 = vsyncpa [#allocation4], 0  ;;  %s1987_s15 = smov [#allocation5]   ;;  %s1988_s17 = smov [#allocation2]  }
   0x3   :  { %s29_s16 = sshll.u32 %s1987_s15, 4  ;;  %s17_s18 = sshll.u32 %s1988_s17, 4  ;;  %s30_s16 = int_to_ptr.vmem [resolvable:$true] %s29_s16  ;;  %s2018_s18 = int_to_ptr.vmem [resolvable:$true] %s17_s18 }
   0x4   :  { %s1893_s21 = scalar_lea.hbm %s2311_s1, 2048 }
   0x5   :  { %p1894_p0 = scmp.ne.s32.totalorder %s2311_s1, %s1893_s21  ;;  %p1897_p1 = scmp.lt.u32.totalorder %s1893_s21, %s2311_s1 }
   0x7   :  { %p1899_p2 = pnand %p1897_p1, %p1894_p0 }
   0x9   :  { %1902 = shalt.err (!%p1899_p2)
}
   0xa   :  { %s1903_s26 = scalar_lea.vmem %s30_s16, 2048  ;;  %p1908_p4 = scmp.lt.s32.totalorder %s30_s16, %s30_s16 }
   0xb   :  { %p1904_p3 = scmp.ne.s32.totalorder %s30_s16, %s1903_s26  ;;  %p1909_p5 = scmp.lt.s32.totalorder %s1903_s26, %s1903_s26 }
   0xd   :  { %p1910_p6 = por %p1909_p5, %p1908_p4 }
   0xf   :  { %p1911_p7 = pnand %p1910_p6, %p1904_p3 }
  0x11   :  { %1914 = shalt.err (!%p1911_p7)
}
  0x12   :  { %s1989_s27 = smov 128   ;;  %s1990_s28 = smov 8  }
  0x13   :  { %35 = dma.hbm_to_vmem [thread:$0]  %s2311_s1, 2048, %s30_s16, [#allocation6], %s1989_s27, %s1989_s27, %s1990_s28  }
  0x14   :  { %s1915_s7 = scalar_lea.hbm %s2310_s0, 256 }
  0x15   :  { %p1916_p8 = scmp.ne.s32.totalorder %s2310_s0, %s1915_s7  ;;  %p1919_p9 = scmp.lt.u32.totalorder %s1915_s7, %s2310_s0 }
  0x17   :  { %p1921_p10 = pnand %p1919_p9, %p1916_p8 }
  0x19   :  { %1924 = shalt.err (!%p1921_p10)
}
  0x1a   :  { %s1925_s12 = scalar_lea.vmem %s2018_s18, 256  ;;  %p1930_p12 = scmp.lt.s32.totalorder %s2018_s18, %s2018_s18 }
  0x1b   :  { %p1926_p11 = scmp.ne.s32.totalorder %s2018_s18, %s1925_s12  ;;  %p1931_p13 = scmp.lt.s32.totalorder %s1925_s12, %s1925_s12 }
  0x1d   :  { %p1932_p0 = por %p1931_p13, %p1930_p12 }
  0x1f   :  { %p1933_p1 = pnand %p1932_p0, %p1926_p11 }
  0x21   :  { %1936 = shalt.err (!%p1933_p1)
}
  0x22   :  { %23 = dma.hbm_to_vmem [thread:$0]  %s2310_s0, 256, %s2018_s18, [#allocation3], %s1989_s27, %s1989_s27, %s1990_s28  }
  0x23   :  { %s1991_s14 = smov [#allocation7]   ;;  %s1937_s19 = scalar_lea.hbm %s2312_s2, 2048 }
  0x24   :  { %s41_s15 = sshll.u32 %s1991_s14, 4  ;;  %p1938_p2 = scmp.ne.s32.totalorder %s2312_s2, %s1937_s19  ;;  %s42_s15 = int_to_ptr.vmem [resolvable:$true] %s41_s15 }
  0x25   :  { %p1941_p3 = scmp.lt.u32.totalorder %s1937_s19, %s2312_s2 }
  0x27   :  { %p1943_p4 = pnand %p1941_p3, %p1938_p2 }
  0x29   :  { %1946 = shalt.err (!%p1943_p4)
}
  0x2a   :  { %s1947_s24 = scalar_lea.vmem %s42_s15, 2048  ;;  %p1952_p6 = scmp.lt.s32.totalorder %s42_s15, %s42_s15 }
  0x2b   :  { %p1948_p5 = scmp.ne.s32.totalorder %s42_s15, %s1947_s24  ;;  %p1953_p7 = scmp.lt.s32.totalorder %s1947_s24, %s1947_s24 }
  0x2d   :  { %p1954_p8 = por %p1953_p7, %p1952_p6 }
  0x2f   :  { %p1955_p9 = pnand %p1954_p8, %p1948_p5 }
  0x31   :  { %1958 = shalt.err (!%p1955_p9)
}
  0x32   :  { %47 = dma.hbm_to_vmem [thread:$0]  %s2312_s2, 2048, %s42_s15, [#allocation6], %s1989_s27, %s1989_s27, %s1990_s28  }
  0x33   :  { %1981 = dma.done.wait [#allocation3], 256  }
  0x34   :  { %1982 = vsyncadd [#allocation3], 4294967040 }
  0x35   :  { %1983 = dma.done.wait [#allocation6], 4096  }
  0x36   :  { %1984 = vsyncadd [#allocation6], 4294963200  ;;  %v73_v0 = vld [vmem:[#allocation5] sm:$0xff]  ;;  %v74_v1 = vld [vmem:[#allocation5 + $0x8] sm:$0xff] }
  0x37   :  { %v75_v2 = vld [vmem:[#allocation5 + $0x10] sm:$0xff]  ;;  %v2070_v3 = vpack.c.bf16 %v74_v1, %v73_v0  ;;  %v76_v4 = vld [vmem:[#allocation5 + $0x18] sm:$0xff]  ;;  %v77_v6 = vld [vmem:[#allocation5 + $0x20] sm:$0xff] }
  0x38   :  { %v2072_v5 = vpack.c.bf16 %v76_v4, %v75_v2  ;;  %v78_v7 = vld [vmem:[#allocation5 + $0x28] sm:$0xff]  ;;  %v79_v9 = vld [vmem:[#allocation5 + $0x30] sm:$0xff]  ;;  %v80_v12 = vld [vmem:[#allocation5 + $0x38] sm:$0xff] }
  0x39   :  { %1524 = vmatprep.subr.bf16.mxu0 %v2070_v3  ;;  %v2077_v8 = vpack.c.bf16 %v78_v7, %v77_v6  ;;  %v2082_v10 = vld [vmem:[%s2313_s3] ss:$0 sm:$0xff]  ;;  %v89_v13 = vld [vmem:[#allocation7] sm:$0xff]  ;;  %v90_v14 = vld [vmem:[#allocation7 + $0x8] sm:$0xff]  ;;  %v2096_v22 = vpack.c.bf16 %v80_v12, %v79_v9  ;;  %s1992_s3 = smov [#allocation8]  }
  0x3a   :  { %1526 = vmatpush3.bf16.msra.mxu0 %v2070_v3  ;;  %v2084_v11 = vld [vmem:[#allocation2] sm:$0xff]  ;;  %1205 = vmatprep.mubr.f32.mxu0 %v2082_v10  ;;  %v2088_v15 = vld [vmem:[#allocation2 + $0x8] sm:$0xff]  ;;  %v2090_v16 = vpack.c.bf16 %v90_v14, %v89_v13  ;;  %v93_v20 = vld [vmem:[#allocation7 + $0x20] sm:$0xff]  ;;  %s979_s26 = sshll.u32 %s1992_s3, 4  ;;  %s980_s26 = int_to_ptr.vmem [resolvable:$true] %s979_s26 }
  0x3b   :  { %1528 = vmatprep.subr.bf16.mxu0 %v2072_v5  ;;  %61 = vadd.xlane.f32.xlu0 %v2084_v11  ;;  %v91_v17 = vld [vmem:[#allocation7 + $0x10] sm:$0xff]  ;;  %v92_v18 = vld [vmem:[#allocation7 + $0x18] sm:$0xff]  ;;  %v94_v21 = vld [vmem:[#allocation7 + $0x28] sm:$0xff]  ;;  %s1959_s29 = scalar_lea.vmem %s980_s26, 256  ;;  %p1964_p11 = scmp.lt.s32.totalorder %s980_s26, %s980_s26 }
  0x3c   :  { %v2093_v19 = vpack.c.bf16 %v92_v18, %v91_v17  ;;  %1556 = vmatprep.subr.bf16.mxu1 %v2090_v16  ;;  %v81_v23 = vld [vmem:[#allocation5 + $0x40] sm:$0xff]  ;;  %v82_v24 = vld [vmem:[#allocation5 + $0x48] sm:$0xff]  ;;  %v2102_v25 = vpack.c.bf16 %v94_v21, %v93_v20  ;;  %v83_v27 = vld [vmem:[#allocation5 + $0x50] sm:$0xff]  ;;  %p1960_p10 = scmp.ne.s32.totalorder %s980_s26, %s1959_s29  ;;  %p1965_p12 = scmp.lt.s32.totalorder %s1959_s29, %s1959_s29 }
  0x3d   :  { %1558 = vmatpush3.bf16.msra.mxu1 %v2090_v16  ;;  %v2106_v26 = vpack.c.bf16 %v82_v24, %v81_v23  ;;  %v84_v28 = vld [vmem:[#allocation5 + $0x58] sm:$0xff]  ;;  %v85_v30 = vld [vmem:[#allocation5 + $0x60] sm:$0xff]  ;;  %v86_v31 = vld [vmem:[#allocation5 + $0x68] sm:$0xff] }
  0x3e   :  { %1530 = vmatpush3.bf16.msra.mxu0 %v2072_v5  ;;  %1560 = vmatprep.subr.bf16.mxu1 %v2093_v19  ;;  %v2112_v29 = vpack.c.bf16 %v84_v28, %v83_v27  ;;  %v2117_v32 = vpack.c.bf16 %v86_v31, %v85_v30  ;;  %v87_v33 = vld [vmem:[#allocation5 + $0x70] sm:$0xff]  ;;  %v88_v34 = vld [vmem:[#allocation5 + $0x78] sm:$0xff]  ;;  %v97_v39 = vld [vmem:[#allocation7 + $0x40] sm:$0xff]  ;;  %p1966_p13 = por %p1965_p12, %p1964_p11 }
  0x3f   :  { %1532 = vmatprep.subr.bf16.mxu0 %v2077_v8  ;;  %63 = vadd.xlane.f32.xlu0 %v2088_v15  ;;  %v2121_v35 = vpack.c.bf16 %v88_v34, %v87_v33  ;;  %v95_v36 = vld [vmem:[#allocation7 + $0x30] sm:$0xff]  ;;  %v96_v37 = vld [vmem:[#allocation7 + $0x38] sm:$0xff]  ;;  %v98_v40 = vld [vmem:[#allocation7 + $0x48] sm:$0xff] }
  0x40   :  { %v2127_v38 = vpack.c.bf16 %v96_v37, %v95_v36  ;;  %v2148_v41 = vpack.c.bf16 %v98_v40, %v97_v39  ;;  %v99_v42 = vld [vmem:[#allocation7 + $0x50] sm:$0xff]  ;;  %v100_v43 = vld [vmem:[#allocation7 + $0x58] sm:$0xff]  ;;  %v101_v45 = vld [vmem:[#allocation7 + $0x60] sm:$0xff]  ;;  %p1967_p0 = pnand %p1966_p13, %p1960_p10 }
  0x41   :  { %1562 = vmatpush3.bf16.msra.mxu1 %v2093_v19  ;;  %v2152_v44 = vpack.c.bf16 %v100_v43, %v99_v42  ;;  %v102_v46 = vld [vmem:[#allocation7 + $0x68] sm:$0xff]  ;;  %v103_v48 = vld [vmem:[#allocation7 + $0x70] sm:$0xff]  ;;  %v104_v49 = vld [vmem:[#allocation7 + $0x78] sm:$0xff] }
  0x42   :  { %1534 = vmatpush3.bf16.msra.mxu0 %v2077_v8  ;;  %1564 = vmatprep.subr.bf16.mxu1 %v2102_v25  ;;  %v2154_v47 = vpack.c.bf16 %v102_v46, %v101_v45  ;;  %v2159_v50 = vpack.c.bf16 %v104_v49, %v103_v48 }
  0x43   :  { %1536 = vmatprep.subr.bf16.mxu0 %v2096_v22 }
  0x45   :  { %1566 = vmatpush3.bf16.msra.mxu1 %v2102_v25 }
  0x46   :  { %1538 = vmatpush3.bf16.msra.mxu0 %v2096_v22  ;;  %1568 = vmatprep.subr.bf16.mxu1 %v2127_v38 }
  0x47   :  { %1540 = vmatprep.subr.bf16.mxu0 %v2106_v26 }
  0x49   :  { %1570 = vmatpush3.bf16.msra.mxu1 %v2127_v38 }
  0x4a   :  { %1542 = vmatpush3.bf16.msra.mxu0 %v2106_v26  ;;  %1572 = vmatprep.subr.bf16.mxu1 %v2148_v41 }
  0x4b   :  { %1544 = vmatprep.subr.bf16.mxu0 %v2112_v29 }
  0x4d   :  { %1574 = vmatpush3.bf16.msra.mxu1 %v2148_v41 }
  0x4e   :  { %1546 = vmatpush3.bf16.msra.mxu0 %v2112_v29  ;;  %1576 = vmatprep.subr.bf16.mxu1 %v2152_v44 }
  0x4f   :  { %1548 = vmatprep.subr.bf16.mxu0 %v2117_v32 }
  0x51   :  { %1578 = vmatpush3.bf16.msra.mxu1 %v2152_v44 }
  0x52   :  { %1550 = vmatpush3.bf16.msra.mxu0 %v2117_v32  ;;  %1580 = vmatprep.subr.bf16.mxu1 %v2154_v47 }
  0x53   :  { %1552 = vmatprep.subr.bf16.mxu0 %v2121_v35 }
  0x55   :  { %1582 = vmatpush3.bf16.msra.mxu1 %v2154_v47 }
  0x56   :  { %1554 = vmatpush3.bf16.msra.mxu0 %v2121_v35  ;;  %1584 = vmatprep.subr.bf16.mxu1 %v2159_v50 }
  0x57   :  { %1588 = vmatprep.subr.bf16.mxu0 %v2070_v3 }
  0x59   :  { %1206 = vmatmul.mubr.f32.vlgmr.msra.gmra.mrb[0].mxu0 %v2082_v10  ;;  %1586 = vmatpush3.bf16.msra.mxu1 %v2159_v50 }
  0x5a   :  { %1590 = vmatpush3.bf16.msra.mxu0 %v2070_v3  ;;  %1620 = vmatprep.subr.bf16.mxu1 %v2090_v16 }
  0x5b   :  { %1592 = vmatprep.subr.bf16.mxu0 %v2072_v5 }
  0x5e   :  { %1594 = vmatpush3.bf16.msra.mxu0 %v2072_v5 }
  0x5f   :  { %1596 = vmatprep.subr.bf16.mxu0 %v2077_v8 }
  0x62   :  { %1598 = vmatpush3.bf16.msra.mxu0 %v2077_v8 }
  0x63   :  { %1600 = vmatprep.subr.bf16.mxu0 %v2096_v22 }
  0x66   :  { %1602 = vmatpush3.bf16.msra.mxu0 %v2096_v22 }
  0x67   :  { %1604 = vmatprep.subr.bf16.mxu0 %v2106_v26 }
  0x6a   :  { %1606 = vmatpush3.bf16.msra.mxu0 %v2106_v26 }
  0x6b   :  { %1608 = vmatprep.subr.bf16.mxu0 %v2112_v29 }
  0x6e   :  { %1610 = vmatpush3.bf16.msra.mxu0 %v2112_v29 }
  0x6f   :  { %1612 = vmatprep.subr.bf16.mxu0 %v2117_v32 }
  0x72   :  { %1614 = vmatpush3.bf16.msra.mxu0 %v2117_v32 }
  0x73   :  { %1616 = vmatprep.subr.bf16.mxu0 %v2121_v35 }
  0x76   :  { %1618 = vmatpush3.bf16.msra.mxu0 %v2121_v35 }
  0x77   :  { %1652 = vmatprep.subr.bf16.mxu0 %v2070_v3 }
  0xc8   :  { %v62_v51 = vpop.xlane.xlu0 %61 }
  0xc9   :  { %v65_v54 = vadd.f32 1e-20, %v62_v51 }
  0xcc   :  { %v64_v52 = vpop.xlane.xlu0 %63 }
  0xcd   :  { %v66_v53 = vadd.f32 1e-20, %v64_v52 }
  0xcf   :  { %1849 = vrcp.f32 %v66_v53 }
  0xd0   :  { %1851 = vrcp.f32 %v65_v54 }
  0xd9   :  { %v1850_v59 = vpop.eup %1849 }
  0xda   :  { %v1852_v60 = vpop.eup %1851  ;;  %v2166_v61 = vmul.f32 %v1850_v59, %v2088_v15 }
  0xdb   :  { %v2169_v63 = vmul.f32 %v1852_v60, %v2084_v11 }
 0x12c   :  { %v1207_v55 = vpop.f32.mrb[0].mxu0 }
 0x12d   :  { %v184_v56 = vadd.f32 1e-20, %v1207_v55  ;;  %v178_v57 = vpop.f32.mrb[1].mxu0 }
 0x12e   :  { %v179_v58 = vadd.f32 1e-20, %v178_v57 }
 0x12f   :  { %1853 = vrcp.f32 %v184_v56 }
 0x130   :  { %1855 = vrcp.f32 %v179_v58 }
 0x139   :  { %v1854_v62 = vpop.eup %1853 }
 0x13a   :  { %v1856_v0 = vpop.eup %1855  ;;  %v192_v2 = vmul.f32 %v1854_v62, %v2166_v61 }
 0x13b   :  { %v191_v1 = vmul.f32 %v1856_v0, %v2169_v63 }
 0x13d   :  { %1240 = vmatprep.mubr.f32.mxu1 %v191_v1 }
 0x13e   :  { %1241 = vmatmul.mubr.f32.vlgmr.msra.gmra.mrb[0].mxu1 %v192_v2 }
 0x13f   :  { %1622 = vmatpush3.bf16.msra.mxu1 %v2090_v16 }
 0x140   :  { %1624 = vmatprep.subr.bf16.mxu1 %v2093_v19 }
 0x143   :  { %1626 = vmatpush3.bf16.msra.mxu1 %v2093_v19 }
 0x144   :  { %1628 = vmatprep.subr.bf16.mxu1 %v2102_v25 }
 0x147   :  { %1630 = vmatpush3.bf16.msra.mxu1 %v2102_v25 }
 0x148   :  { %1632 = vmatprep.subr.bf16.mxu1 %v2127_v38 }
 0x14b   :  { %1634 = vmatpush3.bf16.msra.mxu1 %v2127_v38 }
 0x14c   :  { %1636 = vmatprep.subr.bf16.mxu1 %v2148_v41 }
 0x14f   :  { %1638 = vmatpush3.bf16.msra.mxu1 %v2148_v41 }
 0x150   :  { %1640 = vmatprep.subr.bf16.mxu1 %v2152_v44 }
 0x153   :  { %1642 = vmatpush3.bf16.msra.mxu1 %v2152_v44 }
 0x154   :  { %1644 = vmatprep.subr.bf16.mxu1 %v2154_v47 }
 0x157   :  { %1646 = vmatpush3.bf16.msra.mxu1 %v2154_v47 }
 0x158   :  { %1648 = vmatprep.subr.bf16.mxu1 %v2159_v50 }
 0x15b   :  { %1650 = vmatpush3.bf16.msra.mxu1 %v2159_v50 }
 0x15c   :  { %1684 = vmatprep.subr.bf16.mxu1 %v2090_v16 }
 0x211   :  { %v1242_v4 = vpop.f32.mrb[0].mxu1 }
 0x212   :  { %v259_v6 = vpop.f32.mrb[1].mxu1  ;;  %v269_v9 = vmul.f32 %v1242_v4, %v2082_v10 }
 0x213   :  { %v268_v7 = vmul.f32 %v2082_v10, %v259_v6 }
 0x214   :  { %v271_v12 = vadd.f32 %v2082_v10, %v269_v9 }
 0x215   :  { %v270_v11 = vadd.f32 %v2082_v10, %v268_v7 }
 0x217   :  { %272 = vadd.xlane.f32.xlu1 %v270_v11 }
 0x21b   :  { %274 = vadd.xlane.f32.xlu1 %v271_v12 }
 0x2a4   :  { %v273_v13 = vpop.xlane.xlu1 %272 }
 0x2a5   :  { %v276_v14 = vadd.f32 1e-20, %v273_v13 }
 0x2a7   :  { %1857 = vrcp.f32 %v276_v14 }
 0x2a8   :  { %v275_v15 = vpop.xlane.xlu1 %274 }
 0x2a9   :  { %v277_v17 = vadd.f32 1e-20, %v275_v15 }
 0x2ab   :  { %1859 = vrcp.f32 %v277_v17 }
 0x2b1   :  { %v1858_v18 = vpop.eup %1857 }
 0x2b2   :  { %v282_v20 = vmul.f32 %v1858_v18, %v270_v11 }
 0x2b4   :  { %1275 = vmatprep.mubr.f32.mxu0 %v282_v20 }
 0x2b5   :  { %v1860_v21 = vpop.eup %1859 }
 0x2b6   :  { %v283_v23 = vmul.f32 %v1860_v21, %v271_v12 }
 0x2b8   :  { %1276 = vmatmul.mubr.f32.vlgmr.msra.gmra.mrb[2].mxu0 %v283_v23 }
 0x2b9   :  { %1654 = vmatpush3.bf16.msra.mxu0 %v2070_v3 }
 0x2ba   :  { %1656 = vmatprep.subr.bf16.mxu0 %v2072_v5 }
 0x2bd   :  { %1658 = vmatpush3.bf16.msra.mxu0 %v2072_v5 }
 0x2be   :  { %1660 = vmatprep.subr.bf16.mxu0 %v2077_v8 }
 0x2c1   :  { %1662 = vmatpush3.bf16.msra.mxu0 %v2077_v8 }
 0x2c2   :  { %1664 = vmatprep.subr.bf16.mxu0 %v2096_v22 }
 0x2c5   :  { %1666 = vmatpush3.bf16.msra.mxu0 %v2096_v22 }
 0x2c6   :  { %1668 = vmatprep.subr.bf16.mxu0 %v2106_v26 }
 0x2c9   :  { %1670 = vmatpush3.bf16.msra.mxu0 %v2106_v26 }
 0x2ca   :  { %1672 = vmatprep.subr.bf16.mxu0 %v2112_v29 }
 0x2cd   :  { %1674 = vmatpush3.bf16.msra.mxu0 %v2112_v29 }
 0x2ce   :  { %1676 = vmatprep.subr.bf16.mxu0 %v2117_v32 }
 0x2d1   :  { %1678 = vmatpush3.bf16.msra.mxu0 %v2117_v32 }
 0x2d2   :  { %1680 = vmatprep.subr.bf16.mxu0 %v2121_v35 }
 0x2d5   :  { %1682 = vmatpush3.bf16.msra.mxu0 %v2121_v35 }
 0x2d6   :  { %1716 = vmatprep.subr.bf16.mxu0 %v2070_v3 }
 0x38b   :  { %v1277_v10 = vpop.f32.mrb[2].mxu0 }
 0x38c   :  { %v356_v24 = vadd.f32 1e-20, %v1277_v10  ;;  %v350_v27 = vpop.f32.mrb[3].mxu0 }
 0x38d   :  { %v351_v28 = vadd.f32 1e-20, %v350_v27 }
 0x38e   :  { %1861 = vrcp.f32 %v356_v24 }
 0x38f   :  { %1863 = vrcp.f32 %v351_v28 }
 0x398   :  { %v1862_v30 = vpop.eup %1861 }
 0x399   :  { %v1864_v31 = vpop.eup %1863  ;;  %v364_v34 = vmul.f32 %v1862_v30, %v2166_v61 }
 0x39a   :  { %v363_v33 = vmul.f32 %v1864_v31, %v2169_v63 }
 0x39c   :  { %1310 = vmatprep.mubr.f32.mxu1 %v363_v33 }
 0x39d   :  { %1311 = vmatmul.mubr.f32.vlgmr.msra.gmra.mrb[2].mxu1 %v364_v34 }
 0x39e   :  { %1686 = vmatpush3.bf16.msra.mxu1 %v2090_v16 }
 0x39f   :  { %1688 = vmatprep.subr.bf16.mxu1 %v2093_v19 }
 0x3a2   :  { %1690 = vmatpush3.bf16.msra.mxu1 %v2093_v19 }
 0x3a3   :  { %1692 = vmatprep.subr.bf16.mxu1 %v2102_v25 }
 0x3a6   :  { %1694 = vmatpush3.bf16.msra.mxu1 %v2102_v25 }
 0x3a7   :  { %1696 = vmatprep.subr.bf16.mxu1 %v2127_v38 }
 0x3aa   :  { %1698 = vmatpush3.bf16.msra.mxu1 %v2127_v38 }
 0x3ab   :  { %1700 = vmatprep.subr.bf16.mxu1 %v2148_v41 }
 0x3ae   :  { %1702 = vmatpush3.bf16.msra.mxu1 %v2148_v41 }
 0x3af   :  { %1704 = vmatprep.subr.bf16.mxu1 %v2152_v44 }
 0x3b2   :  { %1706 = vmatpush3.bf16.msra.mxu1 %v2152_v44 }
 0x3b3   :  { %1708 = vmatprep.subr.bf16.mxu1 %v2154_v47 }
 0x3b6   :  { %1710 = vmatpush3.bf16.msra.mxu1 %v2154_v47 }
 0x3b7   :  { %1712 = vmatprep.subr.bf16.mxu1 %v2159_v50 }
 0x3ba   :  { %1714 = vmatpush3.bf16.msra.mxu1 %v2159_v50 }
 0x3bb   :  { %1748 = vmatprep.subr.bf16.mxu1 %v2090_v16 }
 0x470   :  { %v1312_v36 = vpop.f32.mrb[2].mxu1 }
 0x471   :  { %v441_v37 = vmul.f32 %v1312_v36, %v283_v23  ;;  %v431_v39 = vpop.f32.mrb[3].mxu1 }
 0x472   :  { %v440_v40 = vmul.f32 %v431_v39, %v282_v20 }
 0x473   :  { %v443_v42 = vadd.f32 %v441_v37, %v283_v23 }
 0x474   :  { %v442_v43 = vadd.f32 %v440_v40, %v282_v20 }
 0x475   :  { %446 = vadd.xlane.f32.xlu1 %v443_v42 }
 0x476   :  { %444 = vadd.xlane.f32.xlu0 %v442_v43 }
 0x502   :  { %v447_v45 = vpop.xlane.xlu1 %446 }
 0x503   :  { %v449_v46 = vadd.f32 1e-20, %v447_v45  ;;  %v445_v48 = vpop.xlane.xlu0 %444 }
 0x504   :  { %v448_v49 = vadd.f32 1e-20, %v445_v48 }
 0x505   :  { %1865 = vrcp.f32 %v449_v46 }
 0x506   :  { %1867 = vrcp.f32 %v448_v49 }
 0x50f   :  { %v1866_v51 = vpop.eup %1865 }
 0x510   :  { %v1868_v52 = vpop.eup %1867  ;;  %v455_v54 = vmul.f32 %v1866_v51, %v443_v42 }
 0x511   :  { %v454_v53 = vmul.f32 %v1868_v52, %v442_v43 }
 0x513   :  { %1345 = vmatprep.mubr.f32.mxu0 %v454_v53 }
 0x514   :  { %1346 = vmatmul.mubr.f32.vlgmr.msra.gmra.mrb[4].mxu0 %v455_v54 }
 0x515   :  { %1718 = vmatpush3.bf16.msra.mxu0 %v2070_v3 }
 0x516   :  { %1720 = vmatprep.subr.bf16.mxu0 %v2072_v5 }
 0x519   :  { %1722 = vmatpush3.bf16.msra.mxu0 %v2072_v5 }
 0x51a   :  { %1724 = vmatprep.subr.bf16.mxu0 %v2077_v8 }
 0x51d   :  { %1726 = vmatpush3.bf16.msra.mxu0 %v2077_v8 }
 0x51e   :  { %1728 = vmatprep.subr.bf16.mxu0 %v2096_v22 }
 0x521   :  { %1730 = vmatpush3.bf16.msra.mxu0 %v2096_v22 }
 0x522   :  { %1732 = vmatprep.subr.bf16.mxu0 %v2106_v26 }
 0x525   :  { %1734 = vmatpush3.bf16.msra.mxu0 %v2106_v26 }
 0x526   :  { %1736 = vmatprep.subr.bf16.mxu0 %v2112_v29 }
 0x529   :  { %1738 = vmatpush3.bf16.msra.mxu0 %v2112_v29 }
 0x52a   :  { %1740 = vmatprep.subr.bf16.mxu0 %v2117_v32 }
 0x52d   :  { %1742 = vmatpush3.bf16.msra.mxu0 %v2117_v32 }
 0x52e   :  { %1744 = vmatprep.subr.bf16.mxu0 %v2121_v35 }
 0x531   :  { %1746 = vmatpush3.bf16.msra.mxu0 %v2121_v35 }
 0x532   :  { %1780 = vmatprep.subr.bf16.mxu0 %v2070_v3 }
 0x5e7   :  { %v1347_v55 = vpop.f32.mrb[4].mxu0 }
 0x5e8   :  { %v528_v56 = vadd.f32 1e-20, %v1347_v55  ;;  %v522_v57 = vpop.f32.mrb[5].mxu0 }
 0x5e9   :  { %v523_v58 = vadd.f32 1e-20, %v522_v57 }
 0x5ea   :  { %1869 = vrcp.f32 %v528_v56 }
 0x5eb   :  { %1871 = vrcp.f32 %v523_v58 }
 0x5f4   :  { %v1870_v59 = vpop.eup %1869 }
 0x5f5   :  { %v1872_v60 = vpop.eup %1871  ;;  %v536_v0 = vmul.f32 %v1870_v59, %v2166_v61 }
 0x5f6   :  { %v535_v62 = vmul.f32 %v1872_v60, %v2169_v63 }
 0x5f8   :  { %1380 = vmatprep.mubr.f32.mxu1 %v535_v62 }
 0x5f9   :  { %1381 = vmatmul.mubr.f32.vlgmr.msra.gmra.mrb[4].mxu1 %v536_v0 }
 0x5fa   :  { %1750 = vmatpush3.bf16.msra.mxu1 %v2090_v16 }
 0x5fb   :  { %1752 = vmatprep.subr.bf16.mxu1 %v2093_v19 }
 0x5fe   :  { %1754 = vmatpush3.bf16.msra.mxu1 %v2093_v19 }
 0x5ff   :  { %1756 = vmatprep.subr.bf16.mxu1 %v2102_v25 }
 0x602   :  { %1758 = vmatpush3.bf16.msra.mxu1 %v2102_v25 }
 0x603   :  { %1760 = vmatprep.subr.bf16.mxu1 %v2127_v38 }
 0x606   :  { %1762 = vmatpush3.bf16.msra.mxu1 %v2127_v38 }
 0x607   :  { %1764 = vmatprep.subr.bf16.mxu1 %v2148_v41 }
 0x60a   :  { %1766 = vmatpush3.bf16.msra.mxu1 %v2148_v41 }
 0x60b   :  { %1768 = vmatprep.subr.bf16.mxu1 %v2152_v44 }
 0x60e   :  { %1770 = vmatpush3.bf16.msra.mxu1 %v2152_v44 }
 0x60f   :  { %1772 = vmatprep.subr.bf16.mxu1 %v2154_v47 }
 0x612   :  { %1774 = vmatpush3.bf16.msra.mxu1 %v2154_v47 }
 0x613   :  { %1776 = vmatprep.subr.bf16.mxu1 %v2159_v50 }
 0x616   :  { %1778 = vmatpush3.bf16.msra.mxu1 %v2159_v50 }
 0x617   :  { %1812 = vmatprep.subr.bf16.mxu1 %v2090_v16 }
 0x6cc   :  { %v1382_v1 = vpop.f32.mrb[4].mxu1 }
 0x6cd   :  { %v613_v2 = vmul.f32 %v1382_v1, %v455_v54  ;;  %v603_v4 = vpop.f32.mrb[5].mxu1 }
 0x6ce   :  { %v612_v6 = vmul.f32 %v603_v4, %v454_v53 }
 0x6cf   :  { %v615_v7 = vadd.f32 %v613_v2, %v455_v54 }
 0x6d0   :  { %v614_v9 = vadd.f32 %v612_v6, %v454_v53 }
 0x6d1   :  { %618 = vadd.xlane.f32.xlu1 %v615_v7 }
 0x6d2   :  { %616 = vadd.xlane.f32.xlu0 %v614_v9 }
 0x75e   :  { %v619_v11 = vpop.xlane.xlu1 %618 }
 0x75f   :  { %v621_v12 = vadd.f32 1e-20, %v619_v11  ;;  %v617_v13 = vpop.xlane.xlu0 %616 }
 0x760   :  { %v620_v14 = vadd.f32 1e-20, %v617_v13 }
 0x761   :  { %1873 = vrcp.f32 %v621_v12 }
 0x762   :  { %1875 = vrcp.f32 %v620_v14 }
 0x76b   :  { %v1874_v15 = vpop.eup %1873 }
 0x76c   :  { %v1876_v17 = vpop.eup %1875  ;;  %v627_v20 = vmul.f32 %v1874_v15, %v615_v7 }
 0x76d   :  { %v626_v18 = vmul.f32 %v1876_v17, %v614_v9 }
 0x76f   :  { %1415 = vmatprep.mubr.f32.mxu0 %v626_v18 }
 0x770   :  { %1416 = vmatmul.mubr.f32.vlgmr.msra.gmra.mrb[6].mxu0 %v627_v20 }
 0x771   :  { %1782 = vmatpush3.bf16.msra.mxu0 %v2070_v3 }
 0x772   :  { %1784 = vmatprep.subr.bf16.mxu0 %v2072_v5 }
 0x775   :  { %1786 = vmatpush3.bf16.msra.mxu0 %v2072_v5 }
 0x776   :  { %1788 = vmatprep.subr.bf16.mxu0 %v2077_v8 }
 0x779   :  { %1790 = vmatpush3.bf16.msra.mxu0 %v2077_v8 }
 0x77a   :  { %1792 = vmatprep.subr.bf16.mxu0 %v2096_v22 }
 0x77d   :  { %1794 = vmatpush3.bf16.msra.mxu0 %v2096_v22 }
 0x77e   :  { %1796 = vmatprep.subr.bf16.mxu0 %v2106_v26 }
 0x781   :  { %1798 = vmatpush3.bf16.msra.mxu0 %v2106_v26 }
 0x782   :  { %1800 = vmatprep.subr.bf16.mxu0 %v2112_v29 }
 0x785   :  { %1802 = vmatpush3.bf16.msra.mxu0 %v2112_v29 }
 0x786   :  { %1804 = vmatprep.subr.bf16.mxu0 %v2117_v32 }
 0x789   :  { %1806 = vmatpush3.bf16.msra.mxu0 %v2117_v32 }
 0x78a   :  { %1808 = vmatprep.subr.bf16.mxu0 %v2121_v35 }
 0x78d   :  { %1810 = vmatpush3.bf16.msra.mxu0 %v2121_v35 }
 0x843   :  { %v1417_v3 = vpop.f32.mrb[6].mxu0 }
 0x844   :  { %v700_v5 = vadd.f32 1e-20, %v1417_v3  ;;  %v694_v8 = vpop.f32.mrb[7].mxu0 }
 0x845   :  { %v695_v22 = vadd.f32 1e-20, %v694_v8 }
 0x846   :  { %1877 = vrcp.f32 %v700_v5 }
 0x847   :  { %1879 = vrcp.f32 %v695_v22 }
 0x850   :  { %v1878_v21 = vpop.eup %1877 }
 0x851   :  { %v1880_v26 = vpop.eup %1879  ;;  %v708_v29 = vmul.f32 %v1878_v21, %v2166_v61 }
 0x852   :  { %v707_v23 = vmul.f32 %v1880_v26, %v2169_v63 }
 0x854   :  { %1450 = vmatprep.mubr.f32.mxu1 %v707_v23 }
 0x855   :  { %1451 = vmatmul.mubr.f32.vlgmr.msra.gmra.mrb[6].mxu1 %v708_v29 }
 0x856   :  { %1814 = vmatpush3.bf16.msra.mxu1 %v2090_v16 }
 0x857   :  { %1816 = vmatprep.subr.bf16.mxu1 %v2093_v19 }
 0x85a   :  { %1818 = vmatpush3.bf16.msra.mxu1 %v2093_v19 }
 0x85b   :  { %1820 = vmatprep.subr.bf16.mxu1 %v2102_v25 }
 0x85e   :  { %1822 = vmatpush3.bf16.msra.mxu1 %v2102_v25 }
 0x85f   :  { %1824 = vmatprep.subr.bf16.mxu1 %v2127_v38 }
 0x862   :  { %1826 = vmatpush3.bf16.msra.mxu1 %v2127_v38 }
 0x863   :  { %1828 = vmatprep.subr.bf16.mxu1 %v2148_v41 }
 0x866   :  { %1830 = vmatpush3.bf16.msra.mxu1 %v2148_v41 }
 0x867   :  { %1832 = vmatprep.subr.bf16.mxu1 %v2152_v44 }
 0x86a   :  { %1834 = vmatpush3.bf16.msra.mxu1 %v2152_v44 }
 0x86b   :  { %1836 = vmatprep.subr.bf16.mxu1 %v2154_v47 }
 0x86e   :  { %1838 = vmatpush3.bf16.msra.mxu1 %v2154_v47 }
 0x86f   :  { %1840 = vmatprep.subr.bf16.mxu1 %v2159_v50 }
 0x872   :  { %1842 = vmatpush3.bf16.msra.mxu1 %v2159_v50 }
 0x928   :  { %v1452_v16 = vpop.f32.mrb[6].mxu1 }
 0x929   :  { %v785_v19 = vmul.f32 %v1452_v16, %v627_v20  ;;  %v775_v25 = vpop.f32.mrb[7].mxu1 }
 0x92a   :  { %v784_v32 = vmul.f32 %v775_v25, %v626_v18 }
 0x92b   :  { %v787_v35 = vadd.f32 %v785_v19, %v627_v20 }
 0x92c   :  { %v786_v38 = vadd.f32 %v784_v32, %v626_v18 }
 0x92d   :  { %790 = vadd.xlane.f32.xlu1 %v787_v35 }
 0x92e   :  { %788 = vadd.xlane.f32.xlu0 %v786_v38 }
 0x9ba   :  { %v791_v41 = vpop.xlane.xlu1 %790 }
 0x9bb   :  { %v793_v10 = vadd.f32 1e-20, %v791_v41  ;;  %v789_v24 = vpop.xlane.xlu0 %788 }
 0x9bc   :  { %v792_v44 = vadd.f32 1e-20, %v789_v24 }
 0x9bd   :  { %1881 = vrcp.f32 %v793_v10 }
 0x9be   :  { %1883 = vrcp.f32 %v792_v44 }
 0x9c7   :  { %v1882_v27 = vpop.eup %1881 }
 0x9c8   :  { %v1884_v47 = vpop.eup %1883  ;;  %v799_v30 = vmul.f32 %v1882_v27, %v787_v35 }
 0x9c9   :  { %v798_v28 = vmul.f32 %v1884_v47, %v786_v38 }
 0x9cb   :  { %1485 = vmatprep.mubr.f32.mxu0 %v798_v28 }
 0x9cc   :  { %1486 = vmatmul.mubr.f32.vlgmr.msra.gmra.mrb[8].mxu0 %v799_v30 }
 0xa9f   :  { %v1487_v50 = vpop.f32.mrb[8].mxu0 }
 0xaa0   :  { %v872_v31 = vadd.f32 1e-20, %v1487_v50  ;;  %v866_v33 = vpop.f32.mrb[9].mxu0 }
 0xaa1   :  { %v867_v34 = vadd.f32 1e-20, %v866_v33 }
 0xaa2   :  { %1885 = vrcp.f32 %v872_v31 }
 0xaa3   :  { %1887 = vrcp.f32 %v867_v34 }
 0xaac   :  { %v1886_v36 = vpop.eup %1885 }
 0xaad   :  { %v1888_v37 = vpop.eup %1887  ;;  %v880_v40 = vmul.f32 %v1886_v36, %v2166_v61 }
 0xaae   :  { %v879_v39 = vmul.f32 %v1888_v37, %v2169_v63 }
 0xab0   :  { %1520 = vmatprep.mubr.f32.mxu1 %v879_v39 }
 0xab1   :  { %1521 = vmatmul.mubr.f32.vlgmr.msra.gmra.mrb[8].mxu1 %v880_v40 }
 0xb84   :  { %v1522_v42 = vpop.f32.mrb[8].mxu1 }
 0xb85   :  { %v957_v43 = vmul.f32 %v1522_v42, %v799_v30  ;;  %v947_v45 = vpop.f32.mrb[9].mxu1 }
 0xb86   :  { %v956_v46 = vmul.f32 %v947_v45, %v798_v28 }
 0xb87   :  { %v959_v48 = vadd.f32 %v957_v43, %v799_v30 }
 0xb88   :  { %v958_v49 = vadd.f32 %v956_v46, %v798_v28 }
 0xb89   :  { %962 = vadd.xlane.f32.xlu1 %v959_v48 }
 0xb8a   :  { %960 = vadd.xlane.f32.xlu0 %v958_v49 }
 0xc16   :  { %v963_v51 = vpop.xlane.xlu1 %962 }
 0xc17   :  { %v965_v52 = vadd.f32 1e-20, %v963_v51  ;;  %v961_v53 = vpop.xlane.xlu0 %960 }
 0xc18   :  { %v964_v54 = vadd.f32 1e-20, %v961_v53 }
 0xc19   :  { %1889 = vrcp.f32 %v965_v52 }
 0xc1a   :  { %1891 = vrcp.f32 %v964_v54 }
 0xc23   :  { %v1890_v63 = vpop.eup %1889 }
 0xc24   :  { %v1892_v61 = vpop.eup %1891  ;;  %v971_v55 = vmul.f32 %v1890_v63, %v959_v48 }
 0xc25   :  { %v970_v56 = vmul.f32 %v1892_v61, %v958_v49 }
 0xc26   :  { %973 = vst [vmem:[#allocation8 + $0x8] sm:$0xff] %v971_v55 }
 0xc27   :  { %972 = vst [vmem:[#allocation8] sm:$0xff] %v970_v56 }
 0xc28   :  { %1970 = shalt.err (!%p1967_p0)
}
 0xc29   :  { %s1971_s6 = scalar_lea.hbm %s2314_s4, 256 }
 0xc2a   :  { %p1972_p1 = scmp.ne.s32.totalorder %s2314_s4, %s1971_s6  ;;  %p1975_p2 = scmp.lt.u32.totalorder %s1971_s6, %s2314_s4 }
 0xc2c   :  { %p1977_p3 = pnand %p1975_p2, %p1972_p1 }
 0xc2e   :  { %1980 = shalt.err (!%p1977_p3)
}
 0xc2f   :  { %985 = dma.vmem_to_hbm [thread:$0]  %s980_s26, 256, %s2314_s4, [#allocation4], %s1989_s27, %s1989_s27, %s1990_s28  }
 0xc30   :  { %1985 = dma.done.wait [#allocation4], 256  }
 0xc31   :  { %1986 = vsyncadd [#allocation4], 4294967040 }
 0xc32   :  { %989 = vsyncpa [#allocation3], 1 }
 0xc33   :  { %990 = vsyncpa [#allocation6], 1 }
 0xc34   :  { %991 = vsyncpa [#allocation4], 1 }

</bundles_post_ra>
